<compile_context>
chip_gen: v7x
topology: tpu7x:2x2x1
jax: 0.10.0
libtpu: 0.0.40
codegen_flags: <defaults>
</compile_context>

<pallas_src>
import functools

import jax
import jax.numpy as jnp
from jax import lax
from jax.experimental import pallas as pl
from jax.experimental.pallas import tpu as pltpu

_SUB = 8       # f32 sublane tile
_LANE = 128    # lane tile
_CHUNK_ROWS = 256  # rows per in-kernel accumulation step (256x128 f32 = 128 KiB)


def _poisson_loss_kernel(o_ref, t_ref, partial_ref, *, bias, n_elems,
                         block_rows, chunk, masked):
    # o_ref / t_ref: (block_rows, 128) tile.  partial_ref: (1, 8, 128) output.
    j = pl.program_id(0)
    nchunks = block_rows // chunk  # static python int

    if masked:
        # Flat element index of each (row, lane) position within one chunk,
        # hoisted out of the loop (JAX does not CSE broadcasts).
        flat_local = (
            lax.broadcasted_iota(jnp.int32, (chunk, _LANE), 0) * _LANE
            + lax.broadcasted_iota(jnp.int32, (chunk, _LANE), 1)
        )
        block_base = j * (block_rows * _LANE)

    def body(c, acc):
        off = pl.multiple_of(c * chunk, chunk)
        o = o_ref[pl.ds(off, chunk), :].astype(jnp.float32)
        t = t_ref[pl.ds(off, chunk), :].astype(jnp.float32)
        term = o - t * jnp.log(o + bias)
        if masked:
            # Zero out pad / out-of-bounds (garbage) positions.  Select never
            # propagates NaN/Inf from the unselected branch.
            idx = flat_local + (block_base + c * (chunk * _LANE))
            term = jnp.where(idx < n_elems, term, 0.0)
        # Fold (chunk, 128) down to (8, 128) with pure vector adds.
        return acc + jnp.sum(term.reshape(chunk // _SUB, _SUB, _LANE), axis=0)

    acc = lax.fori_loop(0, nchunks, body,
                        jnp.zeros((_SUB, _LANE), jnp.float32))
    partial_ref[...] = acc[None, :, :]


def poisson_loss(output, target, *, bias=1e-12, block_rows=8192,
                 min_pallas_elems=64 * 1024):
    """mean(output - target * log(output + bias)) via a Pallas TPU kernel."""
    assert output.shape == target.shape, "output/target shapes must match"
    n = int(output.size)
    assert 0 < n < 2**31  # element indices are int32 inside the kernel

    # Tiny inputs: the fused XLA expression beats the pallas_call launch cost.
    if n < min_pallas_elems:
        o32 = output.astype(jnp.float32)
        t32 = target.astype(jnp.float32)
        return jnp.mean(o32 - t32 * jnp.log(o32 + bias))

    o = output.reshape(-1)
    t = target.reshape(-1)

    # Pad (values irrelevant — masked in-kernel) only up to one (8,128) tile so
    # the flat array reshapes to (rows, 128) with rows a multiple of 8.
    tile = _SUB * _LANE
    rem = n % tile
    if rem:
        pad = tile - rem
        o = jnp.concatenate([o, jnp.zeros((pad,), dtype=o.dtype)])
        t = jnp.concatenate([t, jnp.zeros((pad,), dtype=t.dtype)])
        n_padded = n + pad
    else:
        n_padded = n
    rows = n_padded // _LANE  # multiple of 8

    o2 = o.reshape(rows, _LANE)
    t2 = t.reshape(rows, _LANE)

    # Block size: big (amortize per-step overhead) but capped so there are
    # >= 2 grid blocks (v7x: 2 TensorCores share the "parallel" grid axis).
    br = max(_SUB, (block_rows // _SUB) * _SUB)
    if rows > _SUB:
        half = -(-rows // 2)
        half = -(-half // _SUB) * _SUB
        br = min(br, half)
    br = min(br, rows)

    # Largest power-of-two chunk (<= _CHUNK_ROWS) that divides the block.
    chunk = _CHUNK_ROWS
    while br % chunk:
        chunk //= 2

    num_blocks = -(-rows // br)
    # Mask only needed if the grid covers more elements than are valid.
    masked = (num_blocks * br * _LANE) != n

    kernel = functools.partial(
        _poisson_loss_kernel, bias=float(bias), n_elems=n,
        block_rows=br, chunk=chunk, masked=masked)

    itemsize = jnp.dtype(o.dtype).itemsize
    partials = pl.pallas_call(
        kernel,
        out_shape=jax.ShapeDtypeStruct((num_blocks, _SUB, _LANE), jnp.float32),
        grid_spec=pltpu.PrefetchScalarGridSpec(
            num_scalar_prefetch=0,
            grid=(num_blocks,),
            in_specs=[
                pl.BlockSpec((br, _LANE), lambda j: (j, 0)),
                pl.BlockSpec((br, _LANE), lambda j: (j, 0)),
            ],
            out_specs=pl.BlockSpec((1, _SUB, _LANE), lambda j: (j, 0, 0)),
        ),
        compiler_params=pltpu.CompilerParams(
            # Each grid step writes its own output block => no carried state,
            # so the axis shards across TensorCores (v7x megacore).
            dimension_semantics=("parallel",),
            # 2 inputs x 2 pipeline buffers x <=4 MiB + small intermediates;
            # lifts v5e's 16 MiB scoped default, safe on v7x's 64 MiB part.
            vmem_limit_bytes=32 * 1024 * 1024,
        ),
        cost_estimate=pl.CostEstimate(
            flops=6 * rows * _LANE,
            transcendentals=rows * _LANE,
            bytes_accessed=2 * rows * _LANE * itemsize
            + num_blocks * _SUB * _LANE * 4,
        ),
    )(o2, t2)

    total = jnp.sum(partials)
    return total / jnp.float32(n)


def _poisson_loss_ref(output, target, bias=1e-12):
    o = output.astype(jnp.float32)
    t = target.astype(jnp.float32)
    return jnp.mean(o - t * jnp.log(o + bias))


if __name__ == "__main__":
    key = jax.random.PRNGKey(0)
    k1, k2, k3, k4 = jax.random.split(key, 4)

    # 1) Pallas path, tile-aligned size (no pad, no mask), f32 inputs.
    shape = (96, 1024)  # 98304 elements
    o1 = jax.random.uniform(k1, shape, jnp.float32, 0.05, 3.0)
    t1 = jnp.floor(jax.random.uniform(k2, shape, jnp.float32, 0.0, 6.0))
    r1 = jax.block_until_ready(poisson_loss(o1, t1))
    e1 = jax.block_until_ready(_poisson_loss_ref(o1, t1))
    assert jnp.allclose(r1, e1, rtol=1e-5, atol=1e-5), (r1, e1)

    # 2) Pallas path, ragged size (tiny pad + in-kernel mask), bf16 inputs
    #    (halves HBM traffic; kernel upcasts and accumulates in f32).
    shape2 = (321, 257)  # 82497 elements, not a multiple of 128
    o2 = jax.random.uniform(k3, shape2, jnp.float32, 0.05, 3.0).astype(jnp.bfloat16)
    t2 = jnp.floor(
        jax.random.uniform(k4, shape2, jnp.float32, 0.0, 6.0)).astype(jnp.bfloat16)
    r2 = jax.block_until_ready(poisson_loss(o2, t2))
    e2 = jax.block_until_ready(_poisson_loss_ref(o2, t2))
    assert jnp.allclose(r2, e2, rtol=1e-3, atol=1e-3), (r2, e2)

    # 3) Small-shape fallback path (below min_pallas_elems).
    o3, t3 = o1[:2, :256], t1[:2, :256]
    r3 = jax.block_until_ready(poisson_loss(o3, t3))
    e3 = jax.block_until_ready(_poisson_loss_ref(o3, t3))
    assert jnp.allclose(r3, e3, rtol=1e-5, atol=1e-5), (r3, e3)

    print("KERNEL_OK")
</pallas_src>

<mosaic_0001>
module attributes {stable_mosaic.version = 11 : i64} {
  func.func @_poisson_loss_kernel(%arg0: i32, %arg1: memref<384x128xf32, #tpu.memory_space<vmem>>, %arg2: memref<384x128xf32, #tpu.memory_space<vmem>>, %arg3: memref<1x8x128xf32, #tpu.memory_space<vmem>>) attributes {dimension_semantics = [#tpu.dimension_semantics<parallel>], iteration_bounds = array<i64: 2>, scalar_prefetch = 0 : i64, scratch_operands = 0 : i64, tpu.core_type = #tpu.core_type<tc>, window_params = [{transform_indices = @transform_0, window_bounds = array<i64: 384, 128>}, {transform_indices = @transform_1, window_bounds = array<i64: 384, 128>}, {transform_indices = @transform_2, window_bounds = array<i64: 1, 8, 128>}]} {
    %cst = arith.constant 0.000000e+00 : f32
    %0 = vector.broadcast %cst : f32 to vector<8x128xf32>
    %c0_i32 = arith.constant 0 : i32
    %c3_i32 = arith.constant 3 : i32
    %1 = arith.addi %c0_i32, %c3_i32 : i32
    %c1_i32 = arith.constant 1 : i32
    %2 = scf.for %arg4 = %c0_i32 to %1 step %c1_i32 iter_args(%arg5 = %0) -> (vector<8x128xf32>)  : i32 {
      %c128_i32 = arith.constant 128 : i32
      %5 = arith.muli %arg4, %c128_i32 : i32
      %6 = tpu.assume_multiple %5, 128 : i32
      %7 = arith.index_cast %6 : i32 to index
      %c0_3 = arith.constant 0 : index
      %8 = vector.load %arg1[%7, %c0_3] : memref<384x128xf32, #tpu.memory_space<vmem>>, vector<128x128xf32>
      %9 = arith.index_cast %6 : i32 to index
      %c0_4 = arith.constant 0 : index
      %10 = vector.load %arg2[%9, %c0_4] : memref<384x128xf32, #tpu.memory_space<vmem>>, vector<128x128xf32>
      %cst_5 = arith.constant 9.99999996E-13 : f32
      %11 = vector.broadcast %cst_5 : f32 to vector<128x128xf32>
      %12 = arith.addf %8, %11 : vector<128x128xf32>
      %13 = math.log %12 : vector<128x128xf32>
      %14 = arith.mulf %10, %13 : vector<128x128xf32>
      %15 = arith.subf %8, %14 : vector<128x128xf32>
      %16 = vector.shape_cast %15 : vector<128x128xf32> to vector<16x8x128xf32>
      %cst_6 = arith.constant dense<0.000000e+00> : vector<8x128xf32>
      %17 = vector.multi_reduction <add>, %16, %cst_6 [0] : vector<16x8x128xf32> to vector<8x128xf32>
      %18 = arith.addf %arg5, %17 : vector<8x128xf32>
      scf.yield %18 : vector<8x128xf32>
    }
    %c3_i32_0 = arith.constant 3 : i32
    %3 = vector.shape_cast %2 : vector<8x128xf32> to vector<1x8x128xf32>
    %c0 = arith.constant 0 : index
    %c0_1 = arith.constant 0 : index
    %c0_2 = arith.constant 0 : index
    %4 = vector.load %arg3[%c0, %c0_1, %c0_2] : memref<1x8x128xf32, #tpu.memory_space<vmem>>, vector<1x8x128xf32>
    tpu.vector_store %arg3[%c0, %c0_1, %c0_2], %3 {strides = array<i32>} : memref<1x8x128xf32, #tpu.memory_space<vmem>>, vector<1x8x128xf32>,
    return
  }
  func.func @transform_0(%arg0: i32) -> (i32, i32) {
    %c0_i32 = arith.constant 0 : i32
    %c0_i32_0 = arith.constant 0 : i32
    return %arg0, %c0_i32 : i32, i32
  }
  func.func @transform_1(%arg0: i32) -> (i32, i32) {
    %c0_i32 = arith.constant 0 : i32
    %c0_i32_0 = arith.constant 0 : i32
    return %arg0, %c0_i32 : i32, i32
  }
  func.func @transform_2(%arg0: i32) -> (i32, i32, i32) {
    %c0_i32 = arith.constant 0 : i32
    %c0_i32_0 = arith.constant 0 : i32
    %c0_i32_1 = arith.constant 0 : i32
    return %arg0, %c0_i32, %c0_i32_0 : i32, i32, i32
  }
}

</mosaic_0001>

<bundles_post_ra>
// kernel: tpu_custom_call.1
= control target key start
LH: loop header
LB: loop body
LE: loop exit
PB: predicated region body
PF: predicated region fallthrough
CT: control target
= control target key end

     0   :  { %7 = vsyncpa [#allocation3], 0  ;;  %s1089_s0 = inlined_call_operand.hbm [shape: f32[768,128], index: 0, kind: input, shape index: {}]   ;;  %s1090_s1 = inlined_call_operand.hbm [shape: f32[768,128], index: 1, kind: input, shape index: {}]   ;;  %s1091_s2 = inlined_call_operand.hbm [shape: f32[2,8,128], index: 2, kind: output, shape index: {}]  }
   0x1   :  { %9 = vsyncpa [#allocation3 + $0x1], 0 }
   0x2   :  { %10 = vsyncpa [#allocation6], 0 }
   0x3   :  { %12 = vsyncpa [#allocation6 + $0x1], 0 }
   0x4   :  { %13 = vsyncpa [#allocation4], 0 }
   0x5   :  { %15 = vsyncpa [#allocation4 + $0x1], 0  ;;  %s748_s9 = smov 0   ;;  %s750_s10 = smov 0  }
   0x6   :  { %s752_s11 = smov 0   ;;  %s754_s12 = smov 0  }
   0x7 LB: > { %s769_s13 = sadd.s32 4294967295, %s718_s12   ;;  %s462_s14 = sadd.s32 4294967294, %s718_s12   ;;  %s718_s12 = sphi %s754_s12, %s1107_s12   ;;  %s714_s11 = sphi %s752_s11, %s1106_s11   ;;  %s710_s10 = sphi %s750_s10, %s1105_s10   ;;  %s706_s9 = sphi %s748_s9, %s1104_s9  }
   0x8   : > { %s773_s15 = sadd.s32 1, %s718_s12   ;;  %s28_s16 = sadd.s32 1, %s714_s11 }
   0x9   : > { %s25_s17 = ssub.s32 %s718_s12, %s773_s15  ;;  %p35_p0 = scmp.ne.s32.totalorder %s714_s11, %s710_s10 }
   0xa   : > { %p26_p1 = scmp.eq.s32.totalorder %s25_s17, 0  ;;  %p36_p2 = scmp.eq.s32.totalorder %s718_s12, 0 }
   0xb   : > { %p41_p3 = scmp.ne.s32.totalorder %s710_s10, %s706_s9  ;;  %p42_p4 = scmp.eq.s32.totalorder %s769_s13, 0 }
   0xc   : > { %s785_s18 = scalar_select %p26_p1, %s714_s11, %s28_s16  }
   0xd   : > { %p37_p5 = por %p36_p2, %p35_p0  ;;  %p787_p6 = por %p42_p4, %p41_p3 }
   0xe   : > { %p91_p7 = scmp.eq.s32.totalorder %s769_s13, 1  ;;  %p97_p8 = scmp.eq.s32.totalorder %s462_s14, 1 }
   0xf   : > { %s1094_s19 = scalar_select %p787_p6, 1, 0 }
  0x10   : > { %p496_p10 = scmp.lt.s32.totalorder %s718_s12, 2  ;;  %p794_p11 = por %p91_p7, %p35_p0 }
  0x11   : > { %p798_p12 = por %p97_p8, %p41_p3  ;;  %s803_s22 = sand.u32 1, %s714_s11  }
  0x12   : > { %s1095_s20 = scalar_select %p794_p11, 1, 0 }
  0x13   : > { %s1096_s21 = scalar_select %p798_p12, 1, 0 }
  0x14   : > { %s474_s23 = smul.u32 6144, %s718_s12  ;;  %p814_p13 = pnand %p496_p10, %p37_p5 }
  0x15   : > { %s476_s24 = smul.u32 384, %s803_s22  ;;  %s118_s3 = scalar_lea.sflag [#allocation3], %s803_s22 }
  0x16   : > { %s812_s27 = scalar_lea.hbm %s1089_s0, %s474_s23  ;;  %p582_p1 = pneg %p814_p13 }
  0x17   : > { %s121_s29 = scalar_lea.vmem [#allocation2], %s476_s24  ;;  %s580_s4 = scalar_lea.hbm %s812_s27, 6144 }
  0x18   : > { %s128_s30 = sshll.u32 %s121_s29, 4  ;;  %p581_p0 = scmp.ne.s32.totalorder %s812_s27, %s580_s4  ;;  %s820_s30 = int_to_ptr.vmem [resolvable:$true] %s128_s30 }
  0x19   : > { %s585_s7 = scalar_lea.hbm %s1089_s0, 12288  ;;  %p586_p4 = scmp.lt.u32.totalorder %s812_s27, %s1089_s0 }
  0x1a   : > { %p583_p2 = pnand %p582_p1, %p581_p0  ;;  %p587_p5 = scmp.lt.u32.totalorder %s585_s7, %s580_s4 }
  0x1b   : > { %p589_p8 = scmp.lt.u32.totalorder %s580_s4, %s812_s27 }
  0x1c   : > { %p584_p3 = pneg %p583_p2  ;;  %p588_p7 = por %p587_p5, %p586_p4 }
  0x1e   : > { %p590_p10 = por %p589_p8, %p588_p7 }
  0x20   : > { %p591_p9 = pnand %p590_p10, %p584_p3 }
  0x22   : > { %594 = shalt.err (!%p591_p9)
}
  0x23   : > { %s595_s16 = scalar_lea.vmem %s820_s30, 6144  ;;  %s728_s17 = smov [#allocation2]  }
  0x24   : > { %p596_p0 = scmp.ne.s32.totalorder %s820_s30, %s595_s16  ;;  %s600_s25 = sshll.u32 %s728_s17, 4  ;;  %s601_s25 = int_to_ptr.vmem [resolvable:$false] %s600_s25 }
  0x25   : > { %s602_s26 = scalar_lea.vmem %s601_s25, 12288  ;;  %p603_p11 = scmp.lt.s32.totalorder %s820_s30, %s601_s25 }
  0x26   : > { %p598_p2 = pnand %p596_p0, %p582_p1  ;;  %p604_p4 = scmp.lt.s32.totalorder %s602_s26, %s595_s16 }
  0x28   : > { %p599_p12 = pneg %p598_p2  ;;  %p605_p5 = por %p604_p4, %p603_p11 }
  0x2a   : > { %p606_p7 = pnand %p605_p5, %p599_p12 }
  0x2c   : > { %609 = shalt.err (!%p606_p7)
}
  0x2d   : > { %s729_s29 = smov 128   ;;  %s730_s4 = smov 8  }
  0x2e   : > { %488 = dma.hbm_to_vmem [thread:$0]  (!%p814_p13), %s812_s27, 6144, %s820_s30, %s118_s3, %s729_s29, %s729_s29, %s730_s4  }
  0x2f   : > { %p467_p9 = scmp.ge.s32.totalorder %s718_s12, 1  ;;  %p157_p11 = scmp.lt.s32.totalorder %s718_s12, 3 }
  0x30   : > { %s864_s8 = scalar_lea.hbm %s1090_s1, %s474_s23  ;;  %s142_s14 = scalar_lea.vmem [#allocation5], %s476_s24 }
  0x31   : > { %p855_p12 = pnand %p467_p9, %p157_p11  ;;  %s149_s16 = sshll.u32 %s142_s14, 4  ;;  %s868_s16 = int_to_ptr.vmem [resolvable:$true] %s149_s16 }
  0x32   : > { %s139_s27 = scalar_lea.sflag [#allocation6], %s803_s22  ;;  %s610_s30 = scalar_lea.hbm %s864_s8, 6144 }
  0x33   : > { %p611_p3 = scmp.ne.s32.totalorder %s864_s8, %s610_s30  ;;  %s615_s23 = scalar_lea.hbm %s1090_s1, 12288 }
  0x34   : > { %p616_p0 = scmp.lt.u32.totalorder %s864_s8, %s1090_s1  ;;  %p617_p2 = scmp.lt.u32.totalorder %s615_s23, %s610_s30 }
  0x35   : > { %p613_p8 = pnand %p611_p3, %p582_p1  ;;  %p619_p5 = scmp.lt.u32.totalorder %s610_s30, %s864_s8 }
  0x36   : > { %p618_p4 = por %p617_p2, %p616_p0 }
  0x37   : > { %p614_p10 = pneg %p613_p8 }
  0x38   : > { %p620_p7 = por %p619_p5, %p618_p4 }
  0x3a   : > { %p621_p9 = pnand %p620_p7, %p614_p10 }
  0x3c   : > { %624 = shalt.err (!%p621_p9)
}
  0x3d   : > { %s625_s24 = scalar_lea.vmem %s868_s16, 6144  ;;  %s731_s6 = smov [#allocation5]  }
  0x3e   : > { %p626_p11 = scmp.ne.s32.totalorder %s868_s16, %s625_s24  ;;  %s630_s7 = sshll.u32 %s731_s6, 4  ;;  %s631_s7 = int_to_ptr.vmem [resolvable:$false] %s630_s7 }
  0x3f   : > { %s632_s14 = scalar_lea.vmem %s631_s7, 12288  ;;  %p633_p6 = scmp.lt.s32.totalorder %s868_s16, %s631_s7 }
  0x40   : > { %p628_p3 = pnand %p626_p11, %p582_p1  ;;  %p634_p0 = scmp.lt.s32.totalorder %s632_s14, %s625_s24 }
  0x42   : > { %p629_p8 = pneg %p628_p3  ;;  %p635_p2 = por %p634_p0, %p633_p6 }
  0x44   : > { %p636_p4 = pnand %p635_p2, %p629_p8 }
  0x46   : > { %639 = shalt.err (!%p636_p4)
}
  0x47   : > { %491 = dma.hbm_to_vmem [thread:$0]  (!%p814_p13), %s864_s8, 6144, %s868_s16, %s139_s27, %s729_s29, %s729_s29, %s730_s4  }
  0x48   : > { %161 = sbr.rel (%p855_p12) target bundleno = 153 (0x99), region = 28  ;;  %s902_s30 = sand.u32 (!%p855_p12), 1, %s710_s10  }
  0x49   : > { %s478_s3 = smul.u32 (!%p855_p12), 384, %s902_s30  ;;  %s164_s17 = scalar_lea.sflag (!%p855_p12), [#allocation3], %s902_s30 }
  0x4a   : > { %p1099_p6 = scmp.ne.s32.totalorder (!%p855_p12), %s1094_s19, 0 }
  0x4b   : > { %s906_s28 = scalar_lea.vmem (!%p855_p12), [#allocation2], %s478_s3 }
  0x4f   : > { %693 = dma.done.wait (%p1099_p6), %s164_s17, 6144  }
  0x50   : > { %695 = vsyncadd (%p1099_p6), %s164_s17, 4294961152  ;;  %s173_s22 = scalar_lea.sflag [#allocation6], %s902_s30  ;;  %s913_s29 = scalar_lea.vmem [#allocation5], %s478_s3 }
  0x51   : > { %697 = dma.done.wait (%p1099_p6), %s173_s22, 6144  }
  0x52   : > { %699 = vsyncadd (%p1099_p6), %s173_s22, 4294961152  ;;  %s468_s4 = sshll.u32 %s902_s30, 3  ;;  %v922_v0 = vmov 0.0   ;;  %s924_s8 = smov 0  }
  0x53   : > { %s920_s5 = scalar_lea.vmem [#allocation7], %s468_s4 }
  0x54 LB: >> { %s469_s19 = sshll.u32 %s726_s8, 7  ;;  %s209_s8 = sadd.s32 1, %s726_s8   ;;  %s726_s8 = sphi %s924_s8, %s209_s8   ;;  %v722_v0 = vphi %v922_v0, %v1100_v0  }
  0x55   : >> { %s936_s16 = scalar_lea.vmem %s906_s28, %s469_s19 [#allocation2]  ;;  %s986_s27 = scalar_lea.vmem %s913_s29, %s469_s19 [#allocation5] }
  0x56   : >> { %v939_v1 = vld [vmem:[%s936_s16] sm:$0xff]  ;;  %v942_v2 = vld [vmem:[%s936_s16 + $0x8] sm:$0xff]  ;;  %v945_v3 = vld [vmem:[%s936_s16 + $0x10] sm:$0xff]  ;;  %p206_p13 = scmp.ge.s32.totalorder %s209_s8, 3  }
  0x57   : >> { %v948_v4 = vld [vmem:[%s936_s16 + $0x18] sm:$0xff]  ;;  %v246_v5 = vadd.f32 1e-12, %v939_v1  ;;  %v952_v6 = vld [vmem:[%s936_s16 + $0x20] sm:$0xff]  ;;  %v247_v7 = vadd.f32 1e-12, %v942_v2 }
  0x58   : >> { %v956_v8 = vld [vmem:[%s936_s16 + $0x28] sm:$0xff]  ;;  %v248_v9 = vadd.f32 1e-12, %v945_v3  ;;  %v960_v10 = vld [vmem:[%s936_s16 + $0x30] sm:$0xff]  ;;  %v249_v11 = vadd.f32 1e-12, %v948_v4 }
  0x59   : >> { %548 = vlog2.f32 %v246_v5  ;;  %v964_v12 = vld [vmem:[%s936_s16 + $0x38] sm:$0xff]  ;;  %v250_v13 = vadd.f32 1e-12, %v952_v6  ;;  %v968_v14 = vld [vmem:[%s936_s16 + $0x40] sm:$0xff]  ;;  %v251_v15 = vadd.f32 1e-12, %v956_v8 }
  0x5a   : >> { %550 = vlog2.f32 %v247_v7  ;;  %v972_v16 = vld [vmem:[%s936_s16 + $0x48] sm:$0xff]  ;;  %v975_v17 = vld [vmem:[%s936_s16 + $0x50] sm:$0xff]  ;;  %v252_v18 = vadd.f32 1e-12, %v960_v10  ;;  %v253_v19 = vadd.f32 1e-12, %v964_v12 }
  0x5b   : >> { %552 = vlog2.f32 %v248_v9  ;;  %v980_v20 = vld [vmem:[%s936_s16 + $0x58] sm:$0xff]  ;;  %v254_v21 = vadd.f32 1e-12, %v968_v14  ;;  %v255_v22 = vadd.f32 1e-12, %v972_v16  ;;  %v991_v24 = vld [vmem:[%s936_s16 + $0x60] sm:$0xff] }
  0x5c   : >> { %554 = vlog2.f32 %v249_v11  ;;  %v256_v23 = vadd.f32 1e-12, %v975_v17  ;;  %v257_v25 = vadd.f32 1e-12, %v980_v20  ;;  %v995_v27 = vld [vmem:[%s936_s16 + $0x68] sm:$0xff]  ;;  %v230_v28 = vld [vmem:[%s986_s27] sm:$0xff] }
  0x5d   : >> { %556 = vlog2.f32 %v250_v13  ;;  %v999_v30 = vld [vmem:[%s936_s16 + $0x70] sm:$0xff]  ;;  %v231_v31 = vld [vmem:[%s986_s27 + $0x8] sm:$0xff]  ;;  %v258_v32 = vadd.f32 1e-12, %v991_v24  ;;  %v1005_v38 = vld [vmem:[%s936_s16 + $0x78] sm:$0xff]  ;;  %s471_s23 = sshll.u32 (%p206_p13), %s769_s13, 7 }
  0x5e   : >> { %558 = vlog2.f32 %v251_v15  ;;  %v232_v35 = vld [vmem:[%s986_s27 + $0x10] sm:$0xff]  ;;  %v233_v39 = vld [vmem:[%s986_s27 + $0x18] sm:$0xff]  ;;  %v259_v40 = vadd.f32 1e-12, %v995_v27  ;;  %v234_v44 = vld [vmem:[%s986_s27 + $0x20] sm:$0xff]  ;;  %s1050_s24 = scalar_lea.hbm (%p206_p13), %s1091_s2, %s471_s23  ;;  %s357_s6 = sshll.u32 (%p206_p13), %s920_s5, 4  ;;  %s358_s6 = int_to_ptr.vmem [resolvable:$true] %s357_s6 }
  0x5f   : >> { %560 = vlog2.f32 %v252_v18  ;;  %v260_v45 = vadd.f32 1e-12, %v999_v30  ;;  %v235_v49 = vld [vmem:[%s986_s27 + $0x28] sm:$0xff]  ;;  %v261_v54 = vadd.f32 1e-12, %v1005_v38  ;;  %v236_v59 = vld [vmem:[%s986_s27 + $0x30] sm:$0xff] }
  0x60   : >> { %562 = vlog2.f32 %v253_v19  ;;  %v237_v13 = vld [vmem:[%s986_s27 + $0x38] sm:$0xff]  ;;  %s344_s7 = scalar_lea.sflag (%p206_p13), [#allocation4], %s902_s30  ;;  %s640_s14 = scalar_lea.vmem (%p206_p13), %s358_s6, 128 }
  0x61   : >> { %564 = vlog2.f32 %v254_v21  ;;  %p641_p1 = scmp.ne.s32.totalorder (%p206_p13), %s358_s6, %s640_s14  ;;  %p1101_p12 = scmp.ne.s32.totalorder (%p206_p13), %s1095_s20, 0 }
  0x62   : >> { %566 = vlog2.f32 %v255_v22  ;;  %v238_v22 = vld [vmem:[%s986_s27 + $0x40] sm:$0xff]  ;;  %s732_s3 = smov (%p206_p13), [#allocation7]  }
  0x63   : >> { %v549_v26 = vpop.eup %548  ;;  %568 = vlog2.f32 %v256_v23  ;;  %p642_p10 = pnand (%p206_p13), %p641_p1, %p1101_p12  ;;  %s644_s17 = sshll.u32 (%p206_p13), %s732_s3, 4  ;;  %s645_s17 = int_to_ptr.vmem [resolvable:$false] %s644_s17 }
  0x64   : >> { %v551_v29 = vpop.eup %550  ;;  %v263_v33 = vmul.f32 0.6931472, %v549_v26  ;;  %570 = vlog2.f32 %v257_v25  ;;  %s646_s28 = scalar_lea.vmem (%p206_p13), %s645_s17, 256  ;;  %p647_p7 = scmp.lt.s32.totalorder (%p206_p13), %s358_s6, %s645_s17 }
  0x65   : >> { %v553_v34 = vpop.eup %552  ;;  %v265_v36 = vmul.f32 0.6931472, %v551_v29  ;;  %572 = vlog2.f32 %v258_v32  ;;  %p643_p5 = pneg (%p206_p13), %p642_p10  ;;  %p648_p9 = scmp.lt.s32.totalorder (%p206_p13), %s646_s28, %s640_s14 }
  0x66   : >> { %v555_v37 = vpop.eup %554  ;;  %v267_v41 = vmul.f32 0.6931472, %v553_v34  ;;  %v294_v42 = vmul.f32 %v263_v33, %v230_v28  ;;  %574 = vlog2.f32 %v259_v40  ;;  %v239_v28 = vld [vmem:[%s986_s27 + $0x48] sm:$0xff]  ;;  %v240_v34 = vld [vmem:[%s986_s27 + $0x50] sm:$0xff] }
  0x67   : >> { %v557_v43 = vpop.eup %556  ;;  %v269_v46 = vmul.f32 0.6931472, %v555_v37  ;;  %v295_v47 = vmul.f32 %v265_v36, %v231_v31  ;;  %576 = vlog2.f32 %v260_v45  ;;  %p649_p11 = por (%p206_p13), %p648_p9, %p647_p7 }
  0x68   : >> { %v559_v48 = vpop.eup %558  ;;  %v271_v50 = vmul.f32 0.6931472, %v557_v43  ;;  %v296_v51 = vmul.f32 %v267_v41, %v232_v35  ;;  %v310_v52 = vsub.f32 %v939_v1, %v294_v42  ;;  %578 = vlog2.f32 %v261_v54  ;;  %v241_v41 = vld [vmem:[%s986_s27 + $0x58] sm:$0xff] }
  0x69   : >> { %v561_v53 = vpop.eup %560  ;;  %v273_v55 = vmul.f32 0.6931472, %v559_v48  ;;  %v297_v56 = vmul.f32 %v269_v46, %v233_v39  ;;  %v311_v57 = vsub.f32 %v942_v2, %v295_v47  ;;  %v242_v46 = vld [vmem:[%s986_s27 + $0x60] sm:$0xff]  ;;  %p650_p3 = pnand (%p206_p13), %p649_p11, %p643_p5 }
  0x6a   : >> { %v563_v58 = vpop.eup %562  ;;  %v275_v60 = vmul.f32 0.6931472, %v561_v53  ;;  %v298_v61 = vmul.f32 %v271_v50, %v234_v44  ;;  %v312_v62 = vsub.f32 %v945_v3, %v296_v51  ;;  %v243_v51 = vld [vmem:[%s986_s27 + $0x68] sm:$0xff] }
  0x6b   : >> { %v565_v63 = vpop.eup %564  ;;  %v277_v5 = vmul.f32 0.6931472, %v563_v58  ;;  %v299_v7 = vmul.f32 %v273_v55, %v235_v49  ;;  %v313_v1 = vsub.f32 %v948_v4, %v297_v56  ;;  %v326_v9 = vadd.f32 %v311_v57, %v310_v52  ;;  %v244_v55 = vld [vmem:[%s986_s27 + $0x70] sm:$0xff] }
  0x6c   : >> { %v567_v11 = vpop.eup %566  ;;  %v279_v15 = vmul.f32 0.6931472, %v565_v63  ;;  %v300_v2 = vmul.f32 %v275_v60, %v236_v59  ;;  %v314_v18 = vsub.f32 %v952_v6, %v298_v61  ;;  %v245_v59 = vld [vmem:[%s986_s27 + $0x78] sm:$0xff] }
  0x6d   : >> { %v327_v19 = vadd.f32 %v326_v9, %v312_v62  ;;  %v569_v21 = vpop.eup %568  ;;  %v281_v3 = vmul.f32 0.6931472, %v567_v11  ;;  %v301_v23 = vmul.f32 %v277_v5, %v237_v13  ;;  %v315_v25 = vsub.f32 %v956_v8, %v299_v7 }
  0x6e   : >> { %v571_v26 = vpop.eup %570  ;;  %v283_v29 = vmul.f32 0.6931472, %v569_v21  ;;  %v302_v31 = vmul.f32 %v279_v15, %v238_v22  ;;  %v316_v32 = vsub.f32 %v960_v10, %v300_v2 }
  0x6f   : >> { %v328_v4 = vadd.f32 %v327_v19, %v313_v1  ;;  %v573_v6 = vpop.eup %572  ;;  %v285_v35 = vmul.f32 0.6931472, %v571_v26  ;;  %v303_v36 = vmul.f32 %v281_v3, %v239_v28  ;;  %v317_v37 = vsub.f32 %v964_v12, %v301_v23 }
  0x70   : >> { %v575_v40 = vpop.eup %574  ;;  %v287_v8 = vmul.f32 0.6931472, %v573_v6  ;;  %v304_v42 = vmul.f32 %v283_v29, %v240_v34  ;;  %v318_v43 = vsub.f32 %v968_v14, %v302_v31 }
  0x71   : >> { %v329_v33 = vadd.f32 %v328_v4, %v314_v18  ;;  %v577_v45 = vpop.eup %576  ;;  %v289_v10 = vmul.f32 0.6931472, %v575_v40  ;;  %v305_v47 = vmul.f32 %v285_v35, %v241_v41  ;;  %v319_v48 = vsub.f32 %v972_v16, %v303_v36 }
  0x72   : >> { %v579_v50 = vpop.eup %578  ;;  %v291_v12 = vmul.f32 0.6931472, %v577_v45  ;;  %v306_v52 = vmul.f32 %v287_v8, %v242_v46  ;;  %v320_v53 = vsub.f32 %v975_v17, %v304_v42 }
  0x73   : >> { %v330_v39 = vadd.f32 %v329_v33, %v315_v25  ;;  %v293_v56 = vmul.f32 0.6931472, %v579_v50  ;;  %v307_v57 = vmul.f32 %v289_v10, %v243_v51  ;;  %v321_v14 = vsub.f32 %v980_v20, %v305_v47 }
  0x74   : >> { %v308_v60 = vmul.f32 %v291_v12, %v244_v55  ;;  %v322_v61 = vsub.f32 %v991_v24, %v306_v52 }
  0x75   : >> { %v331_v44 = vadd.f32 %v330_v39, %v316_v32  ;;  %v309_v16 = vmul.f32 %v293_v56, %v245_v59  ;;  %v323_v63 = vsub.f32 %v995_v27, %v307_v57 }
  0x76   : >> { %v324_v7 = vsub.f32 %v999_v30, %v308_v60 }
  0x77   : >> { %v332_v49 = vadd.f32 %v331_v44, %v317_v37  ;;  %v325_v17 = vsub.f32 %v1005_v38, %v309_v16 }
  0x79   : >> { %v333_v54 = vadd.f32 %v332_v49, %v318_v43 }
  0x7b   : >> { %v334_v58 = vadd.f32 %v333_v54, %v319_v48 }
  0x7d   : >> { %v335_v62 = vadd.f32 %v334_v58, %v320_v53 }
  0x7f   : >> { %v336_v5 = vadd.f32 %v335_v62, %v321_v14 }
  0x81   : >> { %v337_v1 = vadd.f32 %v336_v5, %v322_v61 }
  0x83   : >> { %v338_v9 = vadd.f32 %v337_v1, %v323_v63 }
  0x85   : >> { %v339_v11 = vadd.f32 %v338_v9, %v324_v7  ;;  %208 = sbr.rel (!%p206_p13) target bundleno = 84 (0x54), region = 95 }
  0x87   : >> { %v340_v13 = vadd.f32 %v339_v11, %v325_v17 }
  0x89   : >> { %v341_v20 = vadd.f32 %v722_v0, %v340_v13  }
  0x8b   : >> { %v1100_v0 = vmov %v341_v20  ;;  %342 = vst [vmem:[%s920_s5] sm:$0xff] (%p206_p13), %v341_v20 }
  0x8c   : > { %653 = shalt.err (!%p650_p3)
}
  0x8d   : > { %s654_s13 = scalar_lea.hbm %s1050_s24, 128  ;;  %s658_s29 = scalar_lea.hbm %s1091_s2, 256 }
  0x8e   : > { %p655_p8 = scmp.ne.s32.totalorder %s1050_s24, %s654_s13  ;;  %p659_p4 = scmp.lt.u32.totalorder %s1050_s24, %s1091_s2 }
  0x8f   : > { %p660_p6 = scmp.lt.u32.totalorder %s658_s29, %s654_s13  ;;  %p662_p1 = scmp.lt.u32.totalorder %s654_s13, %s1050_s24 }
  0x90   : > { %p656_p0 = pnand %p655_p8, %p1101_p12 }
  0x91   : > { %p661_p13 = por %p660_p6, %p659_p4 }
  0x92   : > { %p657_p2 = pneg %p656_p0 }
  0x93   : > { %p663_p10 = por %p662_p1, %p661_p13 }
  0x95   : > { %p664_p5 = pnand %p663_p10, %p657_p2 }
  0x97   : > { %667 = shalt.err (!%p664_p5)
}
  0x98   : > { %483 = dma.vmem_to_hbm [thread:$0]  (%p1101_p12), %s358_s6, 128, %s1050_s24, %s344_s7  }
  0x99 PF: > { %s369_s8 = sand.u32 1, %s706_s9   ;;  %p1102_p7 = scmp.ne.s32.totalorder %s1096_s21, 0 }
  0x9a   : > { %p1103_p9 = scmp.ge.s32.totalorder %s718_s12, 2  ;;  %s370_s19 = scalar_lea.sflag [#allocation4], %s369_s8 }
  0x9c   : > { %p493_p11 = pnand %p1103_p9, %p1102_p7 }
  0x9e   : > { %701 = dma.done.wait (!%p493_p11), %s370_s19, 128  }
  0x9f   : > { %703 = vsyncadd (!%p493_p11), %s370_s19, 4294967168  ;;  %p18_p3 = scmp.ge.s32.totalorder %s773_s15, 4   ;;  %s1104_s9 = smov %s710_s10 }
  0xa0   : > { %s1105_s10 = smov %s714_s11  ;;  %s1106_s11 = smov %s785_s18 }
  0xa1   : > { %s1107_s12 = smov %s773_s15  ;;  %20 = sbr.rel (!%p18_p3) target bundleno = 7 (0x7), region = 106 }
  0xa8   :  { %375 = vsyncpa [#allocation3], 1 }
  0xa9   :  { %377 = vsyncpa [#allocation3 + $0x1], 1 }
  0xaa   :  { %378 = vsyncpa [#allocation6], 1 }
  0xab   :  { %380 = vsyncpa [#allocation6 + $0x1], 1 }
  0xac   :  { %381 = vsyncpa [#allocation4], 1 }
  0xad   :  { %383 = vsyncpa [#allocation4 + $0x1], 1 }

</bundles_post_ra>
